<compile_context>
chip_gen: v5e
topology: v5e:2x2
jax: 0.10.0
libtpu: 0.0.40
codegen_flags: <defaults>
</compile_context>

<pallas_src>
import jax
import jax.numpy as jnp
from jax.experimental import pallas as pl
from jax.experimental.pallas import tpu as pltpu

_MIN_NORM = 1e-15
_BALL_EPS = 4e-3          # HGCN PoincareBall.proj eps for float32
_ATANH_CLIP = 1e-7        # float32-safe artanh clamp (HGCN uses 1e-15 in fp64)


def hyp_act_kernel(c_ref, x_ref, o_ref):
    # c_ref: (2,) SMEM scalars [c_in, c_out]
    # x_ref: (TM, D) VMEM input tile (input dtype)
    # o_ref: (TM, D) VMEM output tile (input dtype)
    x = x_ref[...].astype(jnp.float32)
    sqrt_ci = jnp.sqrt(c_ref[0])
    sqrt_co = jnp.sqrt(c_ref[1])

    # --- single read pass: two fused per-row reductions -------------------
    x_sq = x * x
    ssq_x = jnp.sum(x_sq, axis=-1, keepdims=True)                 # ||x||^2
    ssq_r = jnp.sum(jnp.where(x > 0.0, x_sq, 0.0),                # ||relu(x)||^2
                    axis=-1, keepdims=True)

    # --- per-row scalar math (all (TM,1) shaped) ---------------------------
    # logmap0 scale: artanh(sqrt_ci*|x|) / (sqrt_ci*|x|)   (strictly > 0)
    x_norm = jnp.maximum(jnp.sqrt(ssq_x), _MIN_NORM)
    arg = jnp.clip(sqrt_ci * x_norm, -1.0 + _ATANH_CLIP, 1.0 - _ATANH_CLIP)
    artanh = 0.5 * jnp.log((1.0 + arg) / (1.0 - arg))
    s_log = artanh / (sqrt_ci * x_norm)

    # expmap0 scale on u = relu(x) * s_log:  |u| = s_log * ||relu(x)||
    u_norm = jnp.maximum(s_log * jnp.sqrt(ssq_r), _MIN_NORM)
    e_arg = jnp.clip(sqrt_co * u_norm, -15.0, 15.0)
    t = jnp.tanh(e_arg)
    s_exp = t / (sqrt_co * u_norm)

    # proj: ||gamma|| = tanh(e_arg)/sqrt_co analytically
    g_norm = jnp.maximum(t / sqrt_co, _MIN_NORM)
    maxnorm = (1.0 - _BALL_EPS) / sqrt_co
    s_proj = jnp.where(g_norm > maxnorm, maxnorm / g_norm, 1.0)

    scale = s_log * s_exp * s_proj                                  # (TM, 1)

    # --- single write pass --------------------------------------------------
    o_ref[...] = (jnp.maximum(x, 0.0) * scale).astype(o_ref.dtype)


def _row_align(dtype):
    # sublane packing: f32 -> 8, bf16/f16 -> 16, int8/fp8 -> 32
    return {4: 8, 2: 16, 1: 32}.get(jnp.dtype(dtype).itemsize, 8)


def hyp_act(x, c_in, c_out, *, tile_rows=1024,
            vmem_limit_bytes=48 * 1024 * 1024):
    """HypAct forward (PoincareBall manifold, ReLU activation).

    x: (..., D) points on the c_in-curvature Poincare ball.
    Returns an array of the same shape on the c_out ball.
    """
    orig_shape = x.shape
    d = orig_shape[-1]
    x2d = x.reshape(-1, d)
    n = x2d.shape[0]
    align = _row_align(x.dtype)

    if n < align:
        # Tiny input: one block equal to the full array (always legal).
        tm = n
    else:
        # Per-(double-)buffer budget ~4 MiB: in + out + a couple of f32
        # in-register temps stays far below every generation's scoped VMEM.
        per_buf_budget = 4 * 1024 * 1024
        bytes_per_row = d * max(4, jnp.dtype(x.dtype).itemsize)
        vmem_tm = max(align, (per_buf_budget // bytes_per_row) // align * align)
        tm = min(tile_rows, vmem_tm, (n // align) * align)
        # Keep >= 2 grid steps when possible so the "parallel" row axis can be
        # split across both TensorCores on megacore parts (v7x).
        if tm == n and n >= 2 * align:
            half = (n + 1) // 2
            tm = ((half + align - 1) // align) * align

    grid = pl.cdiv(n, tm)
    c_arr = jnp.asarray([c_in, c_out], jnp.float32)

    grid_spec = pltpu.PrefetchScalarGridSpec(
        num_scalar_prefetch=1,
        grid=(grid,),
        in_specs=[pl.BlockSpec((tm, d), lambda i, c: (i, 0))],
        out_specs=pl.BlockSpec((tm, d), lambda i, c: (i, 0)),
    )

    out = pl.pallas_call(
        hyp_act_kernel,
        out_shape=jax.ShapeDtypeStruct((n, d), x.dtype),
        grid_spec=grid_spec,
        compiler_params=pltpu.CompilerParams(
            dimension_semantics=("parallel",),
            vmem_limit_bytes=vmem_limit_bytes),
    )(c_arr, x2d)

    return out.reshape(orig_shape)


def reference_forward(x, c_in, c_out):
    """Pure-JAX reference mirroring HypAct with PoincareBall + ReLU (unfused)."""
    x = x.astype(jnp.float32)
    sqrt_ci = jnp.sqrt(jnp.float32(c_in))
    sqrt_co = jnp.sqrt(jnp.float32(c_out))

    x_norm = jnp.maximum(
        jnp.sqrt(jnp.sum(x * x, axis=-1, keepdims=True)), _MIN_NORM)
    arg = jnp.clip(sqrt_ci * x_norm, -1.0 + _ATANH_CLIP, 1.0 - _ATANH_CLIP)
    artanh = 0.5 * (jnp.log(1.0 + arg) - jnp.log(1.0 - arg))
    xt = x * (artanh / (sqrt_ci * x_norm))

    u = jnp.maximum(xt, 0.0)                       # act = relu; proj_tan0 = id

    u_norm = jnp.maximum(
        jnp.sqrt(jnp.sum(u * u, axis=-1, keepdims=True)), _MIN_NORM)
    gamma = u * (jnp.tanh(jnp.clip(sqrt_co * u_norm, -15.0, 15.0))
                 / (sqrt_co * u_norm))

    g_norm = jnp.maximum(
        jnp.sqrt(jnp.sum(gamma * gamma, axis=-1, keepdims=True)), _MIN_NORM)
    maxnorm = (1.0 - _BALL_EPS) / sqrt_co
    projected = gamma * (maxnorm / g_norm)
    return jnp.where(g_norm > maxnorm, projected, gamma)


if __name__ == "__main__":
    batch, seq, hidden = 2, 8, 32
    c_in, c_out = 1.0, 0.5

    key = jax.random.PRNGKey(0)
    # Points comfortably inside the c_in Poincare ball.
    x = 0.1 * jax.random.normal(key, (batch, seq, hidden), jnp.float32)

    out = hyp_act(x, c_in, c_out)
    out = jax.block_until_ready(out)

    ref = reference_forward(x, c_in, c_out)
    assert out.shape == (batch, seq, hidden)
    assert jnp.allclose(out, ref, atol=1e-5, rtol=1e-5), "mismatch vs reference"

    print("KERNEL_OK")
</pallas_src>

<mosaic_0001>
module attributes {stable_mosaic.version = 11 : i64} {
  func.func @hyp_act_kernel(%arg0: i32, %arg1: memref<2xf32, #tpu.memory_space<smem>>, %arg2: memref<8x32xf32, #tpu.memory_space<vmem>>, %arg3: memref<8x32xf32, #tpu.memory_space<vmem>>) attributes {dimension_semantics = [#tpu.dimension_semantics<parallel>], iteration_bounds = array<i64: 2>, scalar_prefetch = 1 : i64, scratch_operands = 0 : i64, tpu.core_type = #tpu.core_type<tc>, window_params = [{transform_indices = @transform_0, window_bounds = array<i64: 8, 32>}, {transform_indices = @transform_1, window_bounds = array<i64: 8, 32>}]} {
    %c0 = arith.constant 0 : index
    %c0_0 = arith.constant 0 : index
    %0 = vector.load %arg2[%c0, %c0_0] : memref<8x32xf32, #tpu.memory_space<vmem>>, vector<8x32xf32>
    %c0_1 = arith.constant 0 : index
    %1 = memref.load %arg1[%c0_1] : memref<2xf32, #tpu.memory_space<smem>>
    %2 = math.sqrt %1 : f32
    %c1 = arith.constant 1 : index
    %3 = memref.load %arg1[%c1] : memref<2xf32, #tpu.memory_space<smem>>
    %4 = math.sqrt %3 : f32
    %5 = arith.mulf %0, %0 : vector<8x32xf32>
    %cst = arith.constant dense<0.000000e+00> : vector<8xf32>
    %6 = vector.multi_reduction <add>, %5, %cst [1] : vector<8x32xf32> to vector<8xf32>
    %7 = vector.shape_cast %6 : vector<8xf32> to vector<8x1xf32>
    %cst_2 = arith.constant 0.000000e+00 : f32
    %8 = vector.broadcast %cst_2 : f32 to vector<8x32xf32>
    %9 = arith.cmpf ogt, %0, %8 : vector<8x32xf32>
    %cst_3 = arith.constant 0.000000e+00 : f32
    %10 = vector.broadcast %cst_3 : f32 to vector<8x32xf32>
    %11 = arith.select %9, %5, %10 : vector<8x32xi1>, vector<8x32xf32>
    %cst_4 = arith.constant dense<0.000000e+00> : vector<8xf32>
    %12 = vector.multi_reduction <add>, %11, %cst_4 [1] : vector<8x32xf32> to vector<8xf32>
    %13 = vector.shape_cast %12 : vector<8xf32> to vector<8x1xf32>
    %14 = math.sqrt %7 : vector<8x1xf32>
    %cst_5 = arith.constant 1.000000e-15 : f32
    %15 = vector.broadcast %cst_5 : f32 to vector<8x1xf32>
    %16 = arith.maximumf %14, %15 : vector<8x1xf32>
    %17 = vector.broadcast %2 : f32 to vector<8x1xf32>
    %18 = arith.mulf %17, %16 : vector<8x1xf32>
    %cst_6 = arith.constant -0.99999988 : f32
    %cst_7 = arith.constant 0.99999988 : f32
    %19 = vector.broadcast %cst_6 : f32 to vector<8x1xf32>
    %20 = arith.maximumf %19, %18 : vector<8x1xf32>
    %21 = vector.broadcast %cst_7 : f32 to vector<8x1xf32>
    %22 = arith.minimumf %21, %20 : vector<8x1xf32>
    %cst_8 = arith.constant 1.000000e+00 : f32
    %23 = vector.broadcast %cst_8 : f32 to vector<8x1xf32>
    %24 = arith.addf %23, %22 : vector<8x1xf32>
    %cst_9 = arith.constant 1.000000e+00 : f32
    %25 = vector.broadcast %cst_9 : f32 to vector<8x1xf32>
    %26 = arith.subf %25, %22 : vector<8x1xf32>
    %27 = arith.divf %24, %26 : vector<8x1xf32>
    %28 = math.log %27 : vector<8x1xf32>
    %cst_10 = arith.constant 5.000000e-01 : f32
    %29 = vector.broadcast %cst_10 : f32 to vector<8x1xf32>
    %30 = arith.mulf %29, %28 : vector<8x1xf32>
    %31 = vector.broadcast %2 : f32 to vector<8x1xf32>
    %32 = arith.mulf %31, %16 : vector<8x1xf32>
    %33 = arith.divf %30, %32 : vector<8x1xf32>
    %34 = math.sqrt %13 : vector<8x1xf32>
    %35 = arith.mulf %33, %34 : vector<8x1xf32>
    %cst_11 = arith.constant 1.000000e-15 : f32
    %36 = vector.broadcast %cst_11 : f32 to vector<8x1xf32>
    %37 = arith.maximumf %35, %36 : vector<8x1xf32>
    %38 = vector.broadcast %4 : f32 to vector<8x1xf32>
    %39 = arith.mulf %38, %37 : vector<8x1xf32>
    %cst_12 = arith.constant -1.500000e+01 : f32
    %cst_13 = arith.constant 1.500000e+01 : f32
    %40 = vector.broadcast %cst_12 : f32 to vector<8x1xf32>
    %41 = arith.maximumf %40, %39 : vector<8x1xf32>
    %42 = vector.broadcast %cst_13 : f32 to vector<8x1xf32>
    %43 = arith.minimumf %42, %41 : vector<8x1xf32>
    %44 = math.tanh %43 : vector<8x1xf32>
    %45 = vector.broadcast %4 : f32 to vector<8x1xf32>
    %46 = arith.mulf %45, %37 : vector<8x1xf32>
    %47 = arith.divf %44, %46 : vector<8x1xf32>
    %48 = vector.broadcast %4 : f32 to vector<8x1xf32>
    %49 = arith.divf %44, %48 : vector<8x1xf32>
    %cst_14 = arith.constant 1.000000e-15 : f32
    %50 = vector.broadcast %cst_14 : f32 to vector<8x1xf32>
    %51 = arith.maximumf %49, %50 : vector<8x1xf32>
    %cst_15 = arith.constant 0.995999991 : f32
    %52 = arith.divf %cst_15, %4 : f32
    %53 = vector.broadcast %52 : f32 to vector<8x1xf32>
    %54 = arith.cmpf ogt, %51, %53 : vector<8x1xf32>
    %55 = vector.broadcast %52 : f32 to vector<8x1xf32>
    %56 = arith.divf %55, %51 : vector<8x1xf32>
    %cst_16 = arith.constant 1.000000e+00 : f32
    %57 = vector.broadcast %cst_16 : f32 to vector<8x1xf32>
    %58 = arith.select %54, %56, %57 : vector<8x1xi1>, vector<8x1xf32>
    %59 = arith.mulf %33, %47 : vector<8x1xf32>
    %60 = arith.mulf %59, %58 : vector<8x1xf32>
    %cst_17 = arith.constant 0.000000e+00 : f32
    %61 = vector.broadcast %cst_17 : f32 to vector<8x32xf32>
    %62 = arith.maximumf %0, %61 : vector<8x32xf32>
    %63 = vector.broadcast %60 : vector<8x1xf32> to vector<8x32xf32>
    %64 = arith.mulf %62, %63 : vector<8x32xf32>
    %c0_18 = arith.constant 0 : index
    %c0_19 = arith.constant 0 : index
    %65 = vector.load %arg3[%c0_18, %c0_19] : memref<8x32xf32, #tpu.memory_space<vmem>>, vector<8x32xf32>
    tpu.vector_store %arg3[%c0_18, %c0_19], %64 {strides = array<i32>} : memref<8x32xf32, #tpu.memory_space<vmem>>, vector<8x32xf32>,
    return
  }
  func.func @transform_0(%arg0: i32, %arg1: memref<2xf32, #tpu.memory_space<smem>>) -> (i32, i32) {
    %c0_i32 = arith.constant 0 : i32
    %c0_i32_0 = arith.constant 0 : i32
    return %arg0, %c0_i32 : i32, i32
  }
  func.func @transform_1(%arg0: i32, %arg1: memref<2xf32, #tpu.memory_space<smem>>) -> (i32, i32) {
    %c0_i32 = arith.constant 0 : i32
    %c0_i32_0 = arith.constant 0 : i32
    return %arg0, %c0_i32 : i32, i32
  }
}

</mosaic_0001>

<bundles_post_ra>
// kernel: tpu_custom_call.1
= control target key start
LH: loop header
LB: loop body
LE: loop exit
PB: predicated region body
PF: predicated region fallthrough
CT: control target
= control target key end

     0   :  { %s614_s12 = smov [#allocation3]   ;;  %s788_s0 = inlined_call_operand.hbm [shape: f32[2], index: 0, kind: input, shape index: {}]   ;;  %s789_s1 = inlined_call_operand.hbm [shape: f32[16,32], index: 1, kind: input, shape index: {}]   ;;  %s790_s2 = inlined_call_operand.hbm [shape: f32[16,32], index: 2, kind: output, shape index: {}]  }
   0x1   :  { %s8_s11 = sshll.u32 %s788_s0, 4  ;;  %s9_s11 = int_to_ptr.hbm [resolvable:$true] %s8_s11 }
   0x2   :  { %11 = dma.hbm_to_smem %s9_s11, 16, %s614_s12, [#allocation2] }
   0x3   :  { %588 = dma.done.wait [#allocation2], 16 }
   0x4   :  { %589 = vsyncadd [#allocation2], 4294967280 }
   0x5   :  { %14 = sfence }
   0x6   :  { %15 = vsyncpa [#allocation5], 0 }
   0x7   :  { %17 = vsyncpa [#allocation5 + $0x1], 0 }
   0x8   :  { %18 = vsyncpa [#allocation6], 0 }
   0x9   :  { %20 = vsyncpa [#allocation6 + $0x1], 0  ;;  %s633_s13 = smov 0   ;;  %s635_s14 = smov 0  }
   0xa   :  { %s637_s15 = smov 0   ;;  %s639_s16 = smov 0  }
   0xb LB: > { %s654_s0 = sadd.s32 4294967295, %s612_s16   ;;  %s412_s17 = sadd.s32 4294967294, %s612_s16   ;;  %s612_s16 = sphi %s639_s16, %s800_s16   ;;  %s608_s15 = sphi %s637_s15, %s799_s15   ;;  %s604_s14 = sphi %s635_s14, %s798_s14   ;;  %s600_s13 = sphi %s633_s13, %s797_s13  }
   0xc   : > { %s658_s18 = sadd.s32 1, %s612_s16   ;;  %s33_s19 = sadd.s32 1, %s608_s15 }
   0xd   : > { %s30_s20 = ssub.s32 %s612_s16, %s658_s18  ;;  %p40_p0 = scmp.ne.s32.totalorder %s608_s15, %s604_s14 }
   0xe   : > { %p31_p1 = scmp.eq.s32.totalorder %s30_s20, 0  ;;  %p41_p2 = scmp.eq.s32.totalorder %s612_s16, 0 }
   0xf   : > { %p46_p3 = scmp.ne.s32.totalorder %s604_s14, %s600_s13  ;;  %p47_p4 = scmp.eq.s32.totalorder %s654_s0, 0 }
  0x10   : > { %s670_s21 = scalar_select %p31_p1, %s608_s15, %s33_s19  }
  0x11   : > { %p672_p5 = por %p41_p2, %p40_p0  ;;  %p676_p6 = por %p47_p4, %p46_p3 }
  0x12   : > { %p70_p7 = scmp.eq.s32.totalorder %s654_s0, 1  ;;  %p76_p8 = scmp.eq.s32.totalorder %s412_s17, 1 }
  0x13   : > { %p445_p10 = scmp.lt.s32.totalorder %s612_s16, 2  ;;  %s96_s26 = sand.u32 1, %s608_s15  }
  0x14   : > { %p683_p11 = por %p70_p7, %p40_p0  ;;  %p687_p12 = por %p76_p8, %p46_p3 }
  0x15   : > { %s416_s27 = sshll.u32 %s612_s16, 3  ;;  %s415_s28 = sshll.u32 %s96_s26, 3 }
  0x16   : > { %s104_s3 = scalar_lea.hbm %s789_s1, %s416_s27  ;;  %s100_s5 = scalar_lea.vmem [#allocation4], %s415_s28 }
  0x17   : > { %s106_s4 = sshll.u32 %s104_s3, 4  ;;  %s108_s6 = sshll.u32 %s100_s5, 4  ;;  %s107_s4 = int_to_ptr.hbm [resolvable:$true] %s106_s4  ;;  %s109_s6 = int_to_ptr.vmem [resolvable:$true] %s108_s6 }
  0x18   : > { %p698_p13 = pnand %p445_p10, %p672_p5  ;;  %p417_p0 = scmp.ge.s32.totalorder %s612_s16, 1 }
  0x19   : > { %p113_p1 = scmp.lt.s32.totalorder %s612_s16, 3  ;;  %s97_s8 = scalar_lea.sflag [#allocation5], %s96_s26 }
  0x1a   : > { %s514_s9 = sshra.s32 %s107_s4, 4  ;;  %p518_p3 = pneg %p698_p13  ;;  %s515_s9 = int_to_ptr.hbm [resolvable:$true] %s514_s9 }
  0x1b   : > { %s516_s10 = scalar_lea.hbm %s515_s9, 8  ;;  %s521_s17 = scalar_lea.hbm %s789_s1, 16 }
  0x1c   : > { %p517_p2 = scmp.ne.s32.totalorder %s515_s9, %s516_s10  ;;  %p522_p5 = scmp.lt.s32.totalorder %s515_s9, %s789_s1 }
  0x1d   : > { %p523_p8 = scmp.lt.s32.totalorder %s521_s17, %s516_s10 }
  0x1e   : > { %p519_p4 = pnand %p518_p3, %p517_p2 }
  0x1f   : > { %p524_p10 = por %p523_p8, %p522_p5 }
  0x20   : > { %p520_p7 = pneg %p519_p4 }
  0x22   : > { %p525_p9 = pnand %p524_p10, %p520_p7 }
  0x24   : > { %528 = shalt.err (!%p525_p9)
}
  0x25   : > { %440 = dma.hbm_to_vmem [thread:$0]  (!%p698_p13), %s107_s4, 128, %s109_s6, %s97_s8  }
  0x26   : > { %p114_p2 = pnand %p417_p0, %p113_p1 }
  0x27   : > { %s719_s22 = sand.u32 (!%p114_p2), 1, %s604_s14  }
  0x28   : > { %117 = sbr.rel (%p114_p2) target bundleno = 273 (0x111), region = 24  ;;  %s418_s26 = sshll.u32 (!%p114_p2), %s719_s22, 3 }
  0x29   : > { %s120_s27 = scalar_lea.sflag (!%p114_p2), [#allocation5], %s719_s22  ;;  %s123_s28 = scalar_lea.vmem (!%p114_p2), [#allocation4], %s418_s26 }
  0x2d   : > { %591 = dma.done.wait (%p676_p6), %s120_s27, 128  }
  0x2e   : > { %593 = vsyncadd (%p676_p6), %s120_s27, 4294967168  ;;  %s144_s29 = sld [smem:[#allocation3]]  ;;  %v729_v1 = vld [vmem:[%s123_s28] sm:$0xff]  ;;  %vm175_vm0 = vcmask 261120   ;;  %s424_s6 = sshll.u32 %s654_s0, 3 }
  0x2f   : > { %s420_s30 = sld [smem:[#allocation3 + $0x1]]  ;;  %v174_v3 = vmul.f32 %v729_v1, %v729_v1  ;;  %vm179_vm1 = vcmp.gt.f32.partialorder %v729_v1, 0.0  ;;  %s337_s9 = scalar_lea.hbm %s790_s2, %s424_s6 }
  0x30   : > { %s142_s0 = scalar_lea.vmem [#allocation7], %s418_s26  ;;  %s341_s11 = sshll.u32 %s337_s9, 4  ;;  %s342_s11 = int_to_ptr.hbm [resolvable:$true] %s341_s11 }
  0x31   : > { %v176_v4 = vsel %vm175_vm0, %v174_v3, 0.0  ;;  %v180_v5 = vsel %vm179_vm1, %v174_v3, 0.0  ;;  %s339_s10 = sshll.u32 %s142_s0, 4  ;;  %s327_s12 = scalar_lea.sflag [#allocation6], %s719_s22  ;;  %s340_s10 = int_to_ptr.vmem [resolvable:$true] %s339_s10 }
  0x32   : > { %177 = vadd.xlane.f32.xlu0 %v176_v4  ;;  %v181_v9 = vsel %vm175_vm0, %v180_v5, 0.0  ;;  %s558_s17 = sshra.s32 %s342_s11, 4  ;;  %s564_s26 = scalar_lea.hbm %s790_s2, 16  ;;  %s559_s17 = int_to_ptr.hbm [resolvable:$true] %s558_s17 }
  0x33   : > { %s560_s19 = scalar_lea.hbm %s559_s17, 8  ;;  %p565_p0 = scmp.lt.s32.totalorder %s559_s17, %s790_s2 }
  0x34   : > { %v145_v0 = vstv %s144_s29  ;;  %p561_p6 = scmp.ne.s32.totalorder %s559_s17, %s560_s19  ;;  %p566_p1 = scmp.lt.s32.totalorder %s564_s26, %s560_s19 }
  0x35   : > { %480 = vrsqrt.f32 %v145_v0  ;;  %v160_v2 = vstv %s420_s30  ;;  %vm153_vm2 = vcmp.eq.f32.partialorder %v145_v0, inf  ;;  %v156_v18 = vand.u32 2147483648, %v145_v0 }
  0x36   : > { %482 = vrsqrt.f32 %v160_v2  ;;  %vm155_vm3 = vcmp.eq.f32.partialorder %v145_v0, 0.0  ;;  %vm168_vm4 = vcmp.eq.f32.partialorder %v160_v2, inf  ;;  %v171_v21 = vand.u32 2147483648, %v160_v2  ;;  %p562_p9 = pnand %p561_p6, %p683_p11  ;;  %p567_p3 = por %p566_p1, %p565_p0 }
  0x37   : > { %vm170_vm5 = vcmp.eq.f32.partialorder %v160_v2, 0.0 }
  0x38   : > { %p563_p13 = pneg %p562_p9 }
  0x3a   : > { %182 = vadd.xlane.f32.xlu0 %v181_v9  ;;  %p568_p4 = pnand %p567_p3, %p563_p13 }
  0x3b   : > { %v481_v6 = vpop.eup %480 }
  0x3c   : > { %v483_v7 = vpop.eup %482  ;;  %v147_v8 = vmul.f32 %v481_v6, %v145_v0 }
  0x3d   : > { %v162_v10 = vmul.f32 %v483_v7, %v160_v2 }
  0x3e   : > { %v148_v11 = vmul.f32 %v481_v6, %v147_v8 }
  0x3f   : > { %v163_v12 = vmul.f32 %v483_v7, %v162_v10 }
  0x40   : > { %v149_v13 = vmul.f32 0.5, %v148_v11 }
  0x41   : > { %v164_v14 = vmul.f32 0.5, %v163_v12 }
  0x42   : > { %v150_v15 = vsub.f32 1.5, %v149_v13 }
  0x43   : > { %v165_v16 = vsub.f32 1.5, %v164_v14 }
  0x44   : > { %v151_v17 = vmul.f32 %v481_v6, %v150_v15 }
  0x45   : > { %v166_v19 = vmul.f32 %v483_v7, %v165_v16 }
  0x46   : > { %v152_v20 = vmul.f32 %v151_v17, %v145_v0 }
  0x47   : > { %v167_v22 = vmul.f32 %v166_v19, %v160_v2 }
  0x48   : > { %v154_v23 = vsel %vm153_vm2, %v145_v0, %v152_v20 }
  0x49   : > { %v157_v24 = vsel %vm155_vm3, %v156_v18, %v154_v23  ;;  %v169_v25 = vsel %vm168_vm4, %v160_v2, %v167_v22 }
  0x4a   : > { %427 = vpush %v157_v24  ;;  %v172_v26 = vsel %vm170_vm5, %v171_v21, %v169_v25 }
  0x4b   : > { %429 = vpush %v172_v26 }
  0x7b   : > { %s736_s23 = spop %427 }
  0x7c   : > { %s430_s3 = spop %429  ;;  %v197_v49 = vstv %s736_s23 }
  0x7d   : > { %v738_v27 = vstv %s430_s3 }
  0x7e   : > { %484 = vrcp.f32 %v738_v27  ;;  %v281_v32 = vand.u32 2147483648, %v738_v27  ;;  %vm275_vm6 = vweird.f32 %v738_v27  ;;  %v279_v34 = vand.u32 2147483647, %v738_v27 }
  0x80   : > { %v282_v35 = vor.u32 1.1754944e-38, %v281_v32  ;;  %vm280_vm9 = vcmp.eq.f32.partialorder %v279_v34, 8.507059e+37 }
  0x84   : > { %v485_v28 = vpop.eup %484 }
  0x85   : > { %v271_v29 = vmul.f32 %v485_v28, %v738_v27  ;;  %vm276_vm7 = vweird.f32 %v485_v28 }
  0x86   : > { %vm277_vm8 = vmor %vm275_vm6, %vm276_vm7 }
  0x87   : > { %v272_v30 = vsub.f32 1.0, %v271_v29 }
  0x89   : > { %v273_v31 = vmul.f32 %v485_v28, %v272_v30 }
  0x8b   : > { %v274_v33 = vadd.f32 %v485_v28, %v273_v31 }
  0x8d   : > { %v278_v36 = vsel %vm277_vm8, %v485_v28, %v274_v33 }
  0x8e   : > { %v745_v37 = vsel %vm280_vm9, %v282_v35, %v278_v36 }
  0x8f   : > { %431 = vpush %v745_v37 }
  0xa5   : > { %v178_v38 = vpop.xlane.xlu0 %177 }
  0xa6   : > { %486 = vrsqrt.f32 %v178_v38  ;;  %vm191_vm10 = vcmp.eq.f32.partialorder %v178_v38, inf  ;;  %v194_v46 = vand.u32 2147483648, %v178_v38  ;;  %vm193_vm11 = vcmp.eq.f32.partialorder %v178_v38, 0.0 }
  0xac   : > { %v487_v39 = vpop.eup %486 }
  0xad   : > { %v185_v40 = vmul.f32 %v487_v39, %v178_v38  ;;  %v183_v51 = vpop.xlane.xlu0 %182 }
  0xae   : > { %488 = vrsqrt.f32 %v183_v51  ;;  %vm243_vm4 = vcmp.eq.f32.partialorder %v183_v51, inf  ;;  %v246_v22 = vand.u32 2147483648, %v183_v51  ;;  %vm245_vm6 = vcmp.eq.f32.partialorder %v183_v51, 0.0 }
  0xaf   : > { %v186_v41 = vmul.f32 %v487_v39, %v185_v40 }
  0xb1   : > { %v187_v42 = vmul.f32 0.5, %v186_v41 }
  0xb3   : > { %v188_v43 = vsub.f32 1.5, %v187_v42 }
  0xb4   : > { %v489_v55 = vpop.eup %488 }
  0xb5   : > { %v189_v44 = vmul.f32 %v487_v39, %v188_v43  ;;  %v237_v56 = vmul.f32 %v489_v55, %v183_v51 }
  0xb7   : > { %v190_v45 = vmul.f32 %v189_v44, %v178_v38  ;;  %v238_v60 = vmul.f32 %v489_v55, %v237_v56 }
  0xb9   : > { %v192_v47 = vsel %vm191_vm10, %v178_v38, %v190_v45  ;;  %v239_v3 = vmul.f32 0.5, %v238_v60 }
  0xba   : > { %v195_v48 = vsel %vm193_vm11, %v194_v46, %v192_v47 }
  0xbb   : > { %v196_v50 = vmax.f32 %v195_v48, 1e-15  ;;  %v240_v10 = vsub.f32 1.5, %v239_v3 }
  0xbd   : > { %v198_v52 = vmul.f32 %v197_v49, %v196_v50  ;;  %v241_v13 = vmul.f32 %v489_v55, %v240_v10 }
  0xbf   : > { %v421_v53 = vclamps-f32 %v198_v52, 0.9999999  ;;  %v232_v15 = vand.u32 2147483648, %v198_v52  ;;  %vm226_vm2 = vweird.f32 %v198_v52  ;;  %v230_v16 = vand.u32 2147483647, %v198_v52 }
  0xc0   : > { %v242_v17 = vmul.f32 %v241_v13, %v183_v51  ;;  %s432_s4 = spop %431 }
  0xc1   : > { %v202_v54 = vsub.f32 1.0, %v421_v53  ;;  %v201_v7 = vadd.f32 1.0, %v421_v53  ;;  %v233_v21 = vor.u32 1.1754944e-38, %v232_v15  ;;  %vm231_vm5 = vcmp.eq.f32.partialorder %v230_v16, 8.507059e+37  ;;  %s302_s5 = smul.f32 0.996, %s432_s4 }
  0xc2   : > { %v244_v24 = vsel %vm243_vm4, %v183_v51, %v242_v17 }
  0xc3   : > { %490 = vrcp.f32 %v202_v54  ;;  %v214_v63 = vand.u32 2147483648, %v202_v54  ;;  %v212_v2 = vand.u32 2147483647, %v202_v54  ;;  %vm208_vm13 = vweird.f32 %v202_v54 }
  0xc4   : > { %492 = vrcp.f32 %v198_v52  ;;  %v247_v28 = vsel %vm245_vm6, %v246_v22, %v244_v24 }
  0xc5   : > { %v215_v6 = vor.u32 1.1754944e-38, %v214_v63  ;;  %vm213_vm15 = vcmp.eq.f32.partialorder %v212_v2, 8.507059e+37 }
  0xc9   : > { %v491_v57 = vpop.eup %490 }
  0xca   : > { %v493_v58 = vpop.eup %492  ;;  %v204_v59 = vmul.f32 %v491_v57, %v202_v54  ;;  %vm209_vm12 = vweird.f32 %v491_v57  ;;  %v303_v54 = vstv %s302_s5 }
  0xcb   : > { %v222_v62 = vmul.f32 %v493_v58, %v198_v52  ;;  %vm210_vm14 = vmor %vm208_vm13, %vm209_vm12  ;;  %vm227_vm1 = vweird.f32 %v493_v58 }
  0xcc   : > { %v205_v61 = vsub.f32 1.0, %v204_v59  ;;  %vm228_vm3 = vmor %vm226_vm2, %vm227_vm1 }
  0xcd   : > { %v223_v5 = vsub.f32 1.0, %v222_v62 }
  0xce   : > { %v206_v0 = vmul.f32 %v491_v57, %v205_v61 }
  0xcf   : > { %v224_v12 = vmul.f32 %v493_v58, %v223_v5 }
  0xd0   : > { %v207_v4 = vadd.f32 %v491_v57, %v206_v0 }
  0xd1   : > { %v225_v14 = vadd.f32 %v493_v58, %v224_v12 }
  0xd2   : > { %v211_v8 = vsel %vm210_vm14, %v491_v57, %v207_v4 }
  0xd3   : > { %v216_v9 = vsel %vm213_vm15, %v215_v6, %v211_v8  ;;  %v229_v20 = vsel %vm228_vm3, %v493_v58, %v225_v14  ;;  %v323_v58 = vmax.f32 %v729_v1, 0.0 }
  0xd4   : > { %v217_v11 = vmul.f32 %v216_v9, %v201_v7  ;;  %v234_v25 = vsel %vm231_vm5, %v233_v21, %v229_v20 }
  0xd6   : > { %494 = vlog2.f32 %v217_v11 }
  0xdc   : > { %v495_v18 = vpop.eup %494 }
  0xdd   : > { %v219_v19 = vmul.f32 0.6931472, %v495_v18 }
  0xdf   : > { %v220_v23 = vmul.f32 0.5, %v219_v19 }
  0xe1   : > { %v235_v26 = vmul.f32 %v234_v25, %v220_v23 }
  0xe3   : > { %v248_v29 = vmul.f32 %v247_v28, %v235_v26 }
  0xe5   : > { %v249_v30 = vmax.f32 %v248_v29, 1e-15 }
  0xe7   : > { %v251_v31 = vmul.f32 %v738_v27, %v249_v30 }
  0xe9   : > { %496 = vrcp.f32 %v251_v31  ;;  %v422_v32 = vclamps-f32 %v251_v31, 15.0  ;;  %v266_v42 = vand.u32 2147483648, %v251_v31  ;;  %vm260_vm8 = vweird.f32 %v251_v31 }
  0xea   : > { %v264_v44 = vand.u32 2147483647, %v251_v31 }
  0xeb   : > { %498 = vtanh.f32 %v422_v32  ;;  %v267_v46 = vor.u32 1.1754944e-38, %v266_v42 }
  0xec   : > { %vm265_vm10 = vcmp.eq.f32.partialorder %v264_v44, 8.507059e+37 }
  0xef   : > { %v497_v33 = vpop.eup %496 }
  0xf0   : > { %v256_v34 = vmul.f32 %v497_v33, %v251_v31  ;;  %vm261_vm7 = vweird.f32 %v497_v33 }
  0xf1   : > { %v499_v35 = vpop.eup %498  ;;  %vm262_vm9 = vmor %vm260_vm8, %vm261_vm7 }
  0xf2   : > { %v284_v36 = vmul.f32 %v499_v35, %v745_v37  ;;  %v257_v38 = vsub.f32 1.0, %v256_v34 }
  0xf4   : > { %v285_v39 = vmax.f32 %v284_v36, 1e-15  ;;  %v258_v40 = vmul.f32 %v497_v33, %v257_v38 }
  0xf6   : > { %500 = vrcp.f32 %v285_v39  ;;  %v259_v41 = vadd.f32 %v497_v33, %v258_v40  ;;  %v316_v48 = vand.u32 2147483648, %v285_v39  ;;  %v314_v50 = vand.u32 2147483647, %v285_v39 }
  0xf7   : > { %vm310_vm12 = vweird.f32 %v285_v39  ;;  %vm304_vm15 = vcmp.gt.f32.partialorder %v285_v39, %v303_v54 }
  0xf8   : > { %v263_v45 = vsel %vm262_vm9, %v497_v33, %v259_v41  ;;  %v317_v53 = vor.u32 1.1754944e-38, %v316_v48  ;;  %vm315_vm14 = vcmp.eq.f32.partialorder %v314_v50, 8.507059e+37 }
  0xf9   : > { %v268_v37 = vsel %vm265_vm10, %v267_v46, %v263_v45 }
  0xfa   : > { %v269_v52 = vmul.f32 %v499_v35, %v268_v37 }
  0xfc   : > { %v501_v43 = vpop.eup %500  ;;  %v321_v59 = vmul.f32 %v269_v52, %v235_v26 }
  0xfd   : > { %v306_v27 = vmul.f32 %v501_v43, %v285_v39  ;;  %vm311_vm11 = vweird.f32 %v501_v43 }
  0xfe   : > { %vm312_vm13 = vmor %vm310_vm12, %vm311_vm11 }
  0xff   : > { %v307_v47 = vsub.f32 1.0, %v306_v27 }
 0x101   : > { %v308_v49 = vmul.f32 %v501_v43, %v307_v47 }
 0x103   : > { %v309_v51 = vadd.f32 %v501_v43, %v308_v49 }
 0x105   : > { %v313_v55 = vsel %vm312_vm13, %v501_v43, %v309_v51 }
 0x106   : > { %v318_v56 = vsel %vm315_vm14, %v317_v53, %v313_v55 }
 0x107   : > { %v319_v57 = vmul.f32 %v318_v56, %v303_v54 }
 0x109   : > { %v320_v60 = vsel %vm304_vm15, %v319_v57, 1.0 }
 0x10a   : > { %v322_v61 = vmul.f32 %v321_v59, %v320_v60 }
 0x10c   : > { %v324_v62 = vmul.f32 %v323_v58, %v322_v61 }
 0x10e   : > { %325 = vst.msk [vmem:[%s142_s0] sm:$0xff] %vm175_vm0, %v324_v62 }
 0x10f   : > { %571 = shalt.err (!%p568_p4)
}
 0x110   : > { %435 = dma.vmem_to_hbm [thread:$0]  (%p683_p11), %s340_s10, 128, %s342_s11, %s327_s12  }
 0x111 PF: > { %s353_s22 = sand.u32 1, %s600_s13   ;;  %p796_p7 = scmp.ge.s32.totalorder %s612_s16, 2 }
 0x112   : > { %s354_s30 = scalar_lea.sflag [#allocation6], %s353_s22 }
 0x113   : > { %p442_p5 = pnand %p796_p7, %p687_p12 }
 0x115   : > { %p443_p8 = pneg %p442_p5 }
 0x117   : > { %595 = dma.done.wait (%p443_p8), %s354_s30, 128  }
 0x118   : > { %597 = vsyncadd (%p443_p8), %s354_s30, 4294967168  ;;  %p23_p10 = scmp.ge.s32.totalorder %s658_s18, 4   ;;  %s797_s13 = smov %s604_s14 }
 0x119   : > { %s798_s14 = smov %s608_s15  ;;  %s799_s15 = smov %s670_s21 }
 0x11a   : > { %s800_s16 = smov %s658_s18  ;;  %25 = sbr.rel (!%p23_p10) target bundleno = 11 (0xb), region = 69 }
 0x11f   :  { %360 = vsyncpa [#allocation5], 1 }
 0x120   :  { %362 = vsyncpa [#allocation5 + $0x1], 1 }
 0x121   :  { %363 = vsyncpa [#allocation6], 1 }
 0x122   :  { %365 = vsyncpa [#allocation6 + $0x1], 1 }

</bundles_post_ra>
